<compile_context>
chip_gen: v7x
topology: tpu7x:2x2x1
jax: 0.10.0
libtpu: 0.0.40
codegen_flags: <defaults>
</compile_context>

<pallas_src>
import jax
import jax.numpy as jnp
from jax import lax
from jax.experimental import pallas as pl
from jax.experimental.pallas import tpu as pltpu

_MiB = 1024 * 1024


def _vmem_capacity_bytes():
    """Best-effort physical VMEM query; None if unavailable."""
    try:
        info = pltpu.get_tpu_info()
        cap = getattr(info, "vmem_capacity_bytes", None)
        if cap is not None:
            return int(cap)
    except Exception:
        pass
    return None


def _auto_sizes(target_block_bytes):
    """Generation-aware (DMA block target, vmem_limit_bytes)."""
    cap = _vmem_capacity_bytes()
    if cap is not None and cap >= 96 * _MiB:
        # v5e / v6e: 128 MiB physical VMEM -> bigger blocks, higher limit.
        tgt, vmem_limit = 8 * _MiB, 96 * _MiB
    else:
        # v7x (64 MiB physical VMEM) or unknown: stay conservative.
        tgt, vmem_limit = 4 * _MiB, 48 * _MiB
    if target_block_bytes is not None:
        tgt = int(target_block_bytes)
    return tgt, vmem_limit


def _make_tv_kernel(tbc, chunk, bc, h, w, ragged, use_roll):
    """Kernel over one (tbc, h, w) fused-BC block; writes per-block partials."""
    assert tbc % chunk == 0
    n_chunks = tbc // chunk

    def chunk_sums(xc):
        # xc: (chunk, h, w) f32.  Returns squared-diff sums reduced over the
        # chunk axis ONLY (pure VPU vreg adds); the single cross-lane reduce
        # happens once per block, after the loop.
        if use_roll:
            # Aligned spatial dims: full-shape intermediates via XLU rotate
            # (positive shift == jnp.roll semantics; wrap row/col masked out).
            xh = pltpu.roll(xc, shift=h - 1, axis=1)  # xh[:, i, :] = xc[:, i+1 mod h, :]
            xw = pltpu.roll(xc, shift=w - 1, axis=2)
            dh = xh - xc
            dw = xw - xc
            row = lax.broadcasted_iota(jnp.int32, (1, h, 1), 1)
            col = lax.broadcasted_iota(jnp.int32, (1, 1, w), 2)
            dh = jnp.where(row < h - 1, dh, 0.0)
            dw = jnp.where(col < w - 1, dw, 0.0)
        else:
            # Unaligned dims: sliced diffs (proven lowering for arbitrary H/W).
            dh = xc[:, 1:, :] - xc[:, : h - 1, :]
            dw = xc[:, :, 1:] - xc[:, :, : w - 1]
        return jnp.sum(dh * dh, axis=0), jnp.sum(dw * dw, axis=0)

    acc_h_shape = (h, w) if use_roll else (h - 1, w)
    acc_w_shape = (h, w) if use_roll else (h, w - 1)

    def kernel(x_ref, oh_ref, ow_ref):
        base = pl.program_id(0) * tbc  # first fused-slice index of this block

        def body(ci, carry):
            acc_h, acc_w = carry
            start = pl.multiple_of(ci * chunk, chunk)
            xc = x_ref[pl.ds(start, chunk), :, :].astype(jnp.float32)
            if ragged:
                # Padded last block: fused-axis rows >= bc hold garbage (Pallas
                # does NOT zero-fill OOB tile reads).  Select (not multiply) so
                # NaN/Inf garbage cannot propagate into the sum.
                sl = lax.broadcasted_iota(jnp.int32, (chunk, 1, 1), 0) + (base + start)
                xc = jnp.where(sl < bc, xc, 0.0)
            ph, pw = chunk_sums(xc)
            return acc_h + ph, acc_w + pw

        init = (jnp.zeros(acc_h_shape, jnp.float32),
                jnp.zeros(acc_w_shape, jnp.float32))
        acc_h, acc_w = lax.fori_loop(0, n_chunks, body, init,
                                     unroll=(n_chunks <= 8))

        # One small cross-lane reduce per block (XLU is otherwise idle), then a
        # plain scalar splat to a lane-dense (1, 1, 128) store.
        oh_ref[...] = jnp.full((1, 1, 128), jnp.sum(acc_h), dtype=jnp.float32)
        ow_ref[...] = jnp.full((1, 1, 128), jnp.sum(acc_w), dtype=jnp.float32)

    return kernel


def tv_loss(x, tv_loss_weight=1.0, *, target_block_bytes=None, chunk_slices=None):
    """Total variation loss matching the PyTorch TVLoss module exactly."""
    B, C, H, W = x.shape
    if H < 2 or W < 2:
        # Reproduce PyTorch's 0/0 (NaN) behavior for degenerate spatial dims.
        return _tv_loss_ref(x, tv_loss_weight)

    bc = B * C
    x_flat = x.reshape(bc, H, W)
    itemsize = x.dtype.itemsize
    slice_bytes = H * W * itemsize

    tgt_bytes, vmem_limit = _auto_sizes(target_block_bytes)

    # Slices per fori_loop iteration: bounds live f32 intermediates (~4x chunk
    # bytes) to ~2 MiB so the DMA block, not the math, sets peak VMEM.
    if chunk_slices is None:
        chunk = (512 * 1024) // (4 * H * W)
    else:
        chunk = int(chunk_slices)
    chunk = max(1, min(chunk, bc))

    # Fused-BC slices per grid block (one HBM DMA each): a multiple of `chunk`,
    # sized near the generation-aware target.  Non-divisor tbc is fine (ragged
    # last block is masked in-kernel), so bc being prime/awkward never forces
    # tiny blocks.
    chunks_per_block = max(1, tgt_bytes // max(1, slice_bytes * chunk))
    tbc = chunk * chunks_per_block
    bc_padded = ((bc + chunk - 1) // chunk) * chunk
    tbc = min(tbc, bc_padded)
    num_blocks = -(-bc // tbc)

    # Prefer an even number of blocks when there are >= 3: the grid axis is
    # "parallel", so v7x's two TensorCores split it and an odd count leaves one
    # core with an extra block.  Harmless on single-TC chips.
    if num_blocks >= 3 and num_blocks % 2 == 1 and tbc > chunk:
        t = tbc
        while t > chunk and (-(-bc // t)) % 2 == 1:
            t -= chunk
        if (-(-bc // t)) % 2 == 0:
            tbc = t
            num_blocks = -(-bc // tbc)

    ragged = (bc % tbc) != 0
    # roll-based full-shape diffs only where the rotate lowering is unmasked;
    # unaligned spatial dims keep the proven sliced-diff path.
    use_roll = (H % 8 == 0) and (W % 128 == 0)

    kernel = _make_tv_kernel(tbc, chunk, bc, H, W, ragged, use_roll)

    cost = pl.CostEstimate(
        flops=5 * x.size,
        transcendentals=0,
        bytes_accessed=x.size * itemsize + num_blocks * 2 * 128 * 4,
    )

    partial_h, partial_w = pl.pallas_call(
        kernel,
        out_shape=(
            jax.ShapeDtypeStruct((num_blocks, 1, 128), jnp.float32),
            jax.ShapeDtypeStruct((num_blocks, 1, 128), jnp.float32),
        ),
        grid_spec=pltpu.PrefetchScalarGridSpec(
            num_scalar_prefetch=0,
            grid=(num_blocks,),
            in_specs=[pl.BlockSpec((tbc, H, W), lambda i: (i, 0, 0))],
            out_specs=[
                pl.BlockSpec((1, 1, 128), lambda i: (i, 0, 0)),
                pl.BlockSpec((1, 1, 128), lambda i: (i, 0, 0)),
            ],
        ),
        compiler_params=pltpu.CompilerParams(
            dimension_semantics=("parallel",),
            vmem_limit_bytes=vmem_limit,
        ),
        cost_estimate=cost,
    )(x_flat)

    h_tv = jnp.sum(partial_h[:, 0, 0])
    w_tv = jnp.sum(partial_w[:, 0, 0])

    count_h = C * (H - 1) * W
    count_w = C * H * (W - 1)
    return tv_loss_weight * 2.0 * (h_tv / count_h + w_tv / count_w) / B


def _tv_loss_ref(x, tv_loss_weight=1.0):
    B, C, H, W = x.shape
    count_h = C * (H - 1) * W
    count_w = C * H * (W - 1)
    h_tv = jnp.sum((x[:, :, 1:, :] - x[:, :, : H - 1, :]) ** 2)
    w_tv = jnp.sum((x[:, :, :, 1:] - x[:, :, :, : W - 1]) ** 2)
    return tv_loss_weight * 2.0 * (h_tv / count_h + w_tv / count_w) / B


if __name__ == "__main__":
    key = jax.random.PRNGKey(0)

    # Test 1: default configuration (single block, single chunk).
    x = jax.random.normal(key, (2, 4, 16, 16), dtype=jnp.float32)
    out = jax.block_until_ready(tv_loss(x, tv_loss_weight=1.0))
    ref = _tv_loss_ref(x, tv_loss_weight=1.0)
    assert jnp.allclose(out, ref, rtol=1e-5, atol=1e-5), (out, ref)

    # Test 2: forced small blocks/chunks to exercise the multi-block grid,
    # multi-chunk fori_loop and ragged last-block masking (bc = 15, tbc = 4).
    key2 = jax.random.PRNGKey(0)
    x2 = jax.random.normal(key2, (3, 5, 16, 16), dtype=jnp.float32)
    out2 = jax.block_until_ready(
        tv_loss(x2, tv_loss_weight=0.5, target_block_bytes=4096, chunk_slices=2))
    ref2 = _tv_loss_ref(x2, tv_loss_weight=0.5)
    assert jnp.allclose(out2, ref2, rtol=1e-5, atol=1e-5), (out2, ref2)

    print("KERNEL_OK")
</pallas_src>

<mosaic_0001>
module attributes {stable_mosaic.version = 11 : i64} {
  func.func @kernel(%arg0: i32, %arg1: memref<8x16x16xf32, #tpu.memory_space<vmem>>, %arg2: memref<1x1x128xf32, #tpu.memory_space<vmem>>, %arg3: memref<1x1x128xf32, #tpu.memory_space<vmem>>) attributes {dimension_semantics = [#tpu.dimension_semantics<parallel>], iteration_bounds = array<i64: 1>, scalar_prefetch = 0 : i64, scratch_operands = 0 : i64, tpu.core_type = #tpu.core_type<tc>, window_params = [{transform_indices = @transform_0, window_bounds = array<i64: 8, 16, 16>}, {transform_indices = @transform_1, window_bounds = array<i64: 1, 1, 128>}, {transform_indices = @transform_2, window_bounds = array<i64: 1, 1, 128>}]} {
    %cst = arith.constant 0.000000e+00 : f32
    %0 = vector.broadcast %cst : f32 to vector<15x16xf32>
    %cst_0 = arith.constant 0.000000e+00 : f32
    %1 = vector.broadcast %cst_0 : f32 to vector<16x15xf32>
    %c0_i32 = arith.constant 0 : i32
    %c8_i32 = arith.constant 8 : i32
    %2 = arith.muli %c0_i32, %c8_i32 : i32
    %3 = tpu.assume_multiple %2, 8 : i32
    %4 = arith.index_cast %3 : i32 to index
    %c0 = arith.constant 0 : index
    %c0_1 = arith.constant 0 : index
    %5 = vector.load %arg1[%4, %c0, %c0_1] : memref<8x16x16xf32, #tpu.memory_space<vmem>>, vector<8x16x16xf32>
    %6 = vector.extract_strided_slice %5 {offsets = [0, 1, 0], sizes = [8, 15, 16], strides = [1, 1, 1]} : vector<8x16x16xf32> to vector<8x15x16xf32>
    %7 = vector.extract_strided_slice %5 {offsets = [0, 0, 0], sizes = [8, 15, 16], strides = [1, 1, 1]} : vector<8x16x16xf32> to vector<8x15x16xf32>
    %8 = arith.subf %6, %7 : vector<8x15x16xf32>
    %9 = vector.extract_strided_slice %5 {offsets = [0, 0, 1], sizes = [8, 16, 15], strides = [1, 1, 1]} : vector<8x16x16xf32> to vector<8x16x15xf32>
    %10 = vector.extract_strided_slice %5 {offsets = [0, 0, 0], sizes = [8, 16, 15], strides = [1, 1, 1]} : vector<8x16x16xf32> to vector<8x16x15xf32>
    %11 = arith.subf %9, %10 : vector<8x16x15xf32>
    %12 = arith.mulf %8, %8 : vector<8x15x16xf32>
    %cst_2 = arith.constant dense<0.000000e+00> : vector<15x16xf32>
    %13 = vector.multi_reduction <add>, %12, %cst_2 [0] : vector<8x15x16xf32> to vector<15x16xf32>
    %14 = arith.mulf %11, %11 : vector<8x16x15xf32>
    %cst_3 = arith.constant dense<0.000000e+00> : vector<16x15xf32>
    %15 = vector.multi_reduction <add>, %14, %cst_3 [0] : vector<8x16x15xf32> to vector<16x15xf32>
    %16 = arith.addf %0, %13 : vector<15x16xf32>
    %17 = arith.addf %1, %15 : vector<16x15xf32>
    %c1_i32 = arith.constant 1 : i32
    %18 = vector.shape_cast %16 : vector<15x16xf32> to vector<1x15x16xf32>
    %cst_4 = arith.constant dense<0.000000e+00> : vector<1xf32>
    %19 = vector.multi_reduction <add>, %18, %cst_4 [1, 2] : vector<1x15x16xf32> to vector<1xf32>
    %20 = vector.shape_cast %19 : vector<1xf32> to vector<1x1x1xf32>
    %21 = vector.extract %20[0, 0, 0] : f32 from vector<1x1x1xf32>
    %22 = vector.broadcast %21 : f32 to vector<1x1x128xf32>
    %c0_5 = arith.constant 0 : index
    %c0_6 = arith.constant 0 : index
    %c0_7 = arith.constant 0 : index
    %23 = vector.load %arg2[%c0_5, %c0_6, %c0_7] : memref<1x1x128xf32, #tpu.memory_space<vmem>>, vector<1x1x128xf32>
    tpu.vector_store %arg2[%c0_5, %c0_6, %c0_7], %22 {strides = array<i32>} : memref<1x1x128xf32, #tpu.memory_space<vmem>>, vector<1x1x128xf32>,
    %24 = vector.shape_cast %17 : vector<16x15xf32> to vector<1x16x15xf32>
    %cst_8 = arith.constant dense<0.000000e+00> : vector<1xf32>
    %25 = vector.multi_reduction <add>, %24, %cst_8 [1, 2] : vector<1x16x15xf32> to vector<1xf32>
    %26 = vector.shape_cast %25 : vector<1xf32> to vector<1x1x1xf32>
    %27 = vector.extract %26[0, 0, 0] : f32 from vector<1x1x1xf32>
    %28 = vector.broadcast %27 : f32 to vector<1x1x128xf32>
    %c0_9 = arith.constant 0 : index
    %c0_10 = arith.constant 0 : index
    %c0_11 = arith.constant 0 : index
    %29 = vector.load %arg3[%c0_9, %c0_10, %c0_11] : memref<1x1x128xf32, #tpu.memory_space<vmem>>, vector<1x1x128xf32>
    tpu.vector_store %arg3[%c0_9, %c0_10, %c0_11], %28 {strides = array<i32>} : memref<1x1x128xf32, #tpu.memory_space<vmem>>, vector<1x1x128xf32>,
    return
  }
  func.func @transform_0(%arg0: i32) -> (i32, i32, i32) {
    %c0_i32 = arith.constant 0 : i32
    %c0_i32_0 = arith.constant 0 : i32
    %c0_i32_1 = arith.constant 0 : i32
    return %arg0, %c0_i32, %c0_i32_0 : i32, i32, i32
  }
  func.func @transform_1(%arg0: i32) -> (i32, i32, i32) {
    %c0_i32 = arith.constant 0 : i32
    %c0_i32_0 = arith.constant 0 : i32
    %c0_i32_1 = arith.constant 0 : i32
    return %arg0, %c0_i32, %c0_i32_0 : i32, i32, i32
  }
  func.func @transform_2(%arg0: i32) -> (i32, i32, i32) {
    %c0_i32 = arith.constant 0 : i32
    %c0_i32_0 = arith.constant 0 : i32
    %c0_i32_1 = arith.constant 0 : i32
    return %arg0, %c0_i32, %c0_i32_0 : i32, i32, i32
  }
}

</mosaic_0001>

<bundles_post_ra>
// kernel: tpu_custom_call.1
= control target key start
LH: loop header
LB: loop body
LE: loop exit
PB: predicated region body
PF: predicated region fallthrough
CT: control target
= control target key end

     0   :  { %8 = vsyncpa [#allocation3], 0  ;;  %s645_s0 = inlined_call_operand.hbm [shape: f32[8,16,16], index: 0, kind: input, shape index: {}]   ;;  %s646_s1 = inlined_call_operand.hbm [shape: f32[1,1,128], index: 1, kind: output, shape index: {0}]   ;;  %s647_s2 = inlined_call_operand.hbm [shape: f32[1,1,128], index: 2, kind: output, shape index: {1}]  }
   0x1   :  { %9 = vsyncpa [#allocation4], 0 }
   0x2   :  { %10 = vsyncpa [#allocation7], 0  ;;  %s438_s9 = smov [#allocation2]   ;;  %s366_s13 = scalar_lea.hbm %s645_s0, 2048 }
   0x3   :  { %s16_s10 = sshll.u32 %s438_s9, 4  ;;  %p367_p0 = scmp.ne.s32.totalorder %s645_s0, %s366_s13  ;;  %s17_s10 = int_to_ptr.vmem [resolvable:$true] %s16_s10 }
   0x4   :  { %p370_p1 = scmp.lt.u32.totalorder %s366_s13, %s645_s0 }
   0x6   :  { %p372_p2 = pnand %p370_p1, %p367_p0 }
   0x8   :  { %375 = shalt.err (!%p372_p2)
}
   0x9   :  { %s376_s18 = scalar_lea.vmem %s17_s10, 2048  ;;  %p381_p4 = scmp.lt.s32.totalorder %s17_s10, %s17_s10 }
   0xa   :  { %p377_p3 = scmp.ne.s32.totalorder %s17_s10, %s376_s18  ;;  %p382_p5 = scmp.lt.s32.totalorder %s376_s18, %s376_s18 }
   0xc   :  { %p383_p6 = por %p382_p5, %p381_p4 }
   0xe   :  { %p384_p7 = pnand %p383_p6, %p377_p3 }
  0x10   :  { %387 = shalt.err (!%p384_p7)
}
  0x11   :  { %s439_s19 = smov 128   ;;  %s440_s20 = smov 8  }
  0x12   :  { %22 = dma.hbm_to_vmem [thread:$0]  %s645_s0, 2048, %s17_s10, [#allocation3], %s439_s19, %s439_s19, %s440_s20  }
  0x13   :  { %432 = dma.done.wait [#allocation3], 2048  }
  0x14   :  { %433 = vsyncadd [#allocation3], 4294965248  ;;  %v472_v0 = vld [vmem:[#allocation2 + $0x10] sm:$0xff]  ;;  %v474_v1 = vld [vmem:[#allocation2] sm:$0xff]  ;;  %s441_s23 = smov 1   ;;  %vm60_vm0 = vcmask 1040384  }
  0x15   :  { %121 = vrot.lane.b32.xlu1 %v472_v0, %s441_s23  ;;  %117 = vrot.lane.b32.xlu0 %v474_v1, %s441_s23  ;;  %v478_v2 = vld [vmem:[#allocation2 + $0x18] sm:$0xff]  ;;  %v480_v3 = vld [vmem:[#allocation2 + $0x8] sm:$0xff]  ;;  %v486_v5 = vld [vmem:[#allocation2 + $0x20] sm:$0xff]  ;;  %v64_v16 = vrot.slane %v472_v0, 7  ;;  %v61_v17 = vrot.slane %v474_v1, 7  ;;  %vm197_vm1 = vcmask 130049  }
  0x16   :  { %v484_v4 = vld [vmem:[#allocation2 + $0x28] sm:$0xff]  ;;  %v490_v6 = vld [vmem:[#allocation2 + $0x38] sm:$0xff]  ;;  %v492_v7 = vld [vmem:[#allocation2 + $0x30] sm:$0xff]  ;;  %v65_v18 = vrot.slane %v478_v2, 7  ;;  %v62_v19 = vrot.slane %v480_v3, 7  ;;  %v67_v20 = vrot.slane %v486_v5, 7 }
  0x17   :  { %v496_v8 = vld [vmem:[#allocation2 + $0x48] sm:$0xff]  ;;  %v498_v9 = vld [vmem:[#allocation2 + $0x40] sm:$0xff]  ;;  %v502_v10 = vld [vmem:[#allocation2 + $0x58] sm:$0xff]  ;;  %v103_v21 = vsub.f32 %v472_v0, %v64_v16  ;;  %v101_v22 = vsub.f32 %v474_v1, %v61_v17  ;;  %v68_v24 = vrot.slane %v484_v4, 7  ;;  %v71_v34 = vrot.slane %v490_v6, 7  ;;  %s442_s0 = smov 127  }
  0x18   :  { %v504_v11 = vld [vmem:[#allocation2 + $0x50] sm:$0xff]  ;;  %v508_v12 = vld [vmem:[#allocation2 + $0x68] sm:$0xff]  ;;  %v510_v13 = vld [vmem:[#allocation2 + $0x60] sm:$0xff]  ;;  %v66_v23 = vsel %vm60_vm0, %v64_v16, %v65_v18  ;;  %v63_v25 = vsel %vm60_vm0, %v61_v17, %v62_v19  ;;  %v105_v29 = vsub.f32 %v486_v5, %v67_v20  ;;  %v70_v35 = vrot.slane %v492_v7, 7  ;;  %s443_s24 = smov [#allocation5]  }
  0x19   :  { %123 = vrot.lane.b32.xlu1 %v478_v2, %s441_s23  ;;  %119 = vrot.lane.b32.xlu0 %v480_v3, %s441_s23  ;;  %v514_v14 = vld [vmem:[#allocation2 + $0x78] sm:$0xff]  ;;  %v516_v15 = vld [vmem:[#allocation2 + $0x70] sm:$0xff]  ;;  %v104_v28 = vsub.f32 %v478_v2, %v66_v23  ;;  %v183_v30 = vmul.f32 %v103_v21, %v103_v21  ;;  %v181_v31 = vmul.f32 %v101_v22, %v101_v22  ;;  %vm213_vm2 = vcmask 130048   ;;  %s332_s25 = sshll.u32 %s443_s24, 4  ;;  %s333_s25 = int_to_ptr.vmem [resolvable:$true] %s332_s25 }
  0x1a   :  { %v102_v32 = vsub.f32 %v480_v3, %v63_v25  ;;  %v69_v33 = vsel %vm60_vm0, %v67_v20, %v68_v24  ;;  %v185_v40 = vmul.f32 %v105_v29, %v105_v29  ;;  %v72_v44 = vsel %vm60_vm0, %v70_v35, %v71_v34  ;;  %s388_s27 = scalar_lea.vmem %s333_s25, 16  ;;  %s392_s28 = scalar_lea.vmem %s333_s25, 32 }
  0x1b   :  { %v184_v38 = vmul.f32 %v104_v28, %v104_v28  ;;  %v106_v39 = vsub.f32 %v484_v4, %v69_v33  ;;  %v199_v41 = vsel %vm197_vm1, %v183_v30, 0.0  ;;  %v198_v42 = vsel %vm197_vm1, %v181_v31, 0.0  ;;  %p389_p8 = scmp.ne.s32.totalorder %s333_s25, %s388_s27  ;;  %p393_p9 = scmp.lt.s32.totalorder %s333_s25, %s333_s25 }
  0x1c   :  { %v182_v43 = vmul.f32 %v102_v32, %v102_v32  ;;  %v74_v45 = vrot.slane %v496_v8, 7  ;;  %v200_v48 = vadd.f32 %v199_v41, %v198_v42  ;;  %v201_v51 = vsel %vm197_vm1, %v185_v40, 0.0  ;;  %p394_p10 = scmp.lt.s32.totalorder %s392_s28, %s388_s27 }
  0x1d   :  { %127 = vrot.lane.b32.xlu1 %v484_v4, %s441_s23  ;;  %125 = vrot.lane.b32.xlu0 %v486_v5, %s441_s23  ;;  %v215_v49 = vsel %vm213_vm2, %v184_v38, 0.0  ;;  %v186_v50 = vmul.f32 %v106_v39, %v106_v39  ;;  %v73_v53 = vrot.slane %v498_v9, 7  ;;  %v107_v58 = vsub.f32 %v492_v7, %v70_v35 }
  0x1e   :  { %v214_v52 = vsel %vm213_vm2, %v182_v43, 0.0  ;;  %v108_v59 = vsub.f32 %v490_v6, %v72_v44  ;;  %vm245_vm3 = vcmask 130056   ;;  %v76_v31 = vrot.slane %v504_v11, 7  ;;  %p395_p11 = por %p394_p10, %p393_p9 }
  0x1f   :  { %v553_v16 = vadd.f32 %v215_v49, %v214_v52  ;;  %v187_v21 = vmul.f32 %v107_v58, %v107_v58  ;;  %vm282_vm4 = vcmask 1046528   ;;  %vm289_vm5 = vcmask 129024  }
  0x20   :  { %v564_v22 = vmul.f32 %v108_v59, %v108_v59  ;;  %vm311_vm6 = vcmask 121856   ;;  %p396_p12 = pnand %p395_p11, %p389_p8 }
  0x21   :  { %131 = vrot.lane.b32.xlu1 %v490_v6, %s441_s23  ;;  %129 = vrot.lane.b32.xlu0 %v492_v7, %s441_s23 }
  0x25   :  { %135 = vrot.lane.b32.xlu1 %v496_v8, %s441_s23  ;;  %133 = vrot.lane.b32.xlu0 %v498_v9, %s441_s23 }
  0x29   :  { %139 = vrot.lane.b32.xlu1 %v502_v10, %s441_s23  ;;  %137 = vrot.lane.b32.xlu0 %v504_v11, %s441_s23 }
  0x2d   :  { %143 = vrot.lane.b32.xlu1 %v508_v12, %s441_s23  ;;  %141 = vrot.lane.b32.xlu0 %v510_v13, %s441_s23 }
  0x31   :  { %147 = vrot.lane.b32.xlu1 %v514_v14, %s441_s23  ;;  %145 = vrot.lane.b32.xlu0 %v516_v15, %s441_s23 }
  0x87   :  { %v122_v26 = vpop.permute.xlu1 %121  ;;  %v118_v27 = vpop.permute.xlu0 %117 }
  0x88   :  { %v167_v54 = vsub.f32 %v472_v0, %v122_v26  ;;  %v165_v55 = vsub.f32 %v474_v1, %v118_v27  ;;  %v556_v0 = vsel %vm213_vm2, %v186_v50, 0.0  ;;  %v558_v1 = vadd.f32 %v201_v51, %v200_v48 }
  0x89   :  { %v109_v27 = vsub.f32 %v498_v9, %v73_v53 }
  0x8a   :  { %v231_v17 = vmul.f32 %v167_v54, %v167_v54  ;;  %v229_v18 = vmul.f32 %v165_v55, %v165_v55  ;;  %v82_v54 = vrot.slane %v516_v15, 7 }
  0x8b   :  { %v124_v36 = vpop.permute.xlu1 %123  ;;  %v120_v37 = vpop.permute.xlu0 %119 }
  0x8c   :  { %v168_v56 = vsub.f32 %v478_v2, %v124_v36  ;;  %v166_v57 = vsub.f32 %v480_v3, %v120_v37  ;;  %v75_v2 = vsel %vm60_vm0, %v73_v53, %v74_v45  ;;  %v77_v3 = vrot.slane %v502_v10, 7 }
  0x8d   :  { %v110_v28 = vsub.f32 %v496_v8, %v75_v2  ;;  %v246_v32 = vsel %vm245_vm3, %v229_v18, 0.0  ;;  %v203_v37 = vsel %vm197_vm1, %v187_v21, 0.0  ;;  %v189_v45 = vmul.f32 %v109_v27, %v109_v27 }
  0x8e   :  { %v232_v19 = vmul.f32 %v168_v56, %v168_v56  ;;  %v111_v2 = vsub.f32 %v504_v11, %v76_v31  ;;  %v218_v27 = vadd.f32 %v556_v0, %v553_v16 }
  0x8f   :  { %v128_v46 = vpop.permute.xlu1 %127  ;;  %v126_v47 = vpop.permute.xlu0 %125  ;;  %v190_v53 = vmul.f32 %v110_v28, %v110_v28 }
  0x90   :  { %v170_v60 = vsub.f32 %v484_v4, %v128_v46  ;;  %v169_v61 = vsub.f32 %v486_v5, %v126_v47  ;;  %v230_v4 = vmul.f32 %v166_v57, %v166_v57  ;;  %v262_v33 = vsel %vm245_vm3, %v232_v19, 0.0 }
  0x91   :  { %v83_v46 = vrot.slane %v514_v14, 7 }
  0x92   :  { %v234_v23 = vmul.f32 %v170_v60, %v170_v60  ;;  %v233_v24 = vmul.f32 %v169_v61, %v169_v61  ;;  %v261_v34 = vsel %vm245_vm3, %v230_v4, 0.0 }
  0x93   :  { %v132_v62 = vpop.permute.xlu1 %131  ;;  %v130_v63 = vpop.permute.xlu0 %129  ;;  %v263_v48 = vadd.f32 %v262_v33, %v261_v34  ;;  %v205_v33 = vsel %vm197_vm1, %v189_v45, 0.0  ;;  %v191_v34 = vmul.f32 %v111_v2, %v111_v2 }
  0x94   :  { %v172_v5 = vsub.f32 %v490_v6, %v132_v62  ;;  %v171_v20 = vsub.f32 %v492_v7, %v130_v63  ;;  %v80_v6 = vrot.slane %v508_v12, 7  ;;  %v247_v7 = vsel %vm245_vm3, %v231_v17, 0.0 }
  0x95   :  { %v249_v38 = vsel %vm245_vm3, %v233_v24, 0.0  ;;  %v248_v47 = vadd.f32 %v247_v7, %v246_v32  ;;  %v78_v63 = vsel %vm60_vm0, %v76_v31, %v77_v3  ;;  %v219_v32 = vsel %vm213_vm2, %v564_v22, 0.0 }
  0x96   :  { %v236_v35 = vmul.f32 %v172_v5, %v172_v5  ;;  %v235_v36 = vmul.f32 %v171_v20, %v171_v20  ;;  %v112_v7 = vsub.f32 %v502_v10, %v78_v63  ;;  %v207_v45 = vsel %vm197_vm1, %v191_v34, 0.0 }
  0x97   :  { %v136_v25 = vpop.permute.xlu1 %135  ;;  %v134_v26 = vpop.permute.xlu0 %133  ;;  %v250_v56 = vadd.f32 %v249_v38, %v248_v47 }
  0x98   :  { %v174_v29 = vsub.f32 %v496_v8, %v136_v25  ;;  %v173_v30 = vsub.f32 %v498_v9, %v134_v26  ;;  %v79_v8 = vrot.slane %v510_v13, 7  ;;  %v264_v9 = vsel %vm245_vm3, %v234_v23, 0.0 }
  0x99   :  { %v266_v49 = vsel %vm245_vm3, %v236_v35, 0.0  ;;  %v251_v50 = vsel %vm245_vm3, %v235_v36, 0.0  ;;  %v265_v55 = vadd.f32 %v264_v9, %v263_v48 }
  0x9a   :  { %v238_v41 = vmul.f32 %v174_v29, %v174_v29  ;;  %v237_v42 = vmul.f32 %v173_v30, %v173_v30  ;;  %v252_v18 = vadd.f32 %v251_v50, %v250_v56  ;;  %v81_v26 = vsel %vm60_vm0, %v79_v8, %v80_v6 }
  0x9b   :  { %v140_v39 = vpop.permute.xlu1 %139  ;;  %v138_v40 = vpop.permute.xlu0 %137  ;;  %v267_v17 = vadd.f32 %v266_v49, %v265_v55  ;;  %v204_v6 = vadd.f32 %v203_v37, %v558_v1  ;;  %v113_v35 = vsub.f32 %v510_v13, %v79_v8  ;;  %v221_v1 = vsel %vm213_vm2, %v190_v53, 0.0 }
  0x9c   :  { %v176_v43 = vsub.f32 %v502_v10, %v140_v39  ;;  %v175_v44 = vsub.f32 %v504_v11, %v138_v40  ;;  %v268_v59 = vsel %vm245_vm3, %v238_v41, 0.0  ;;  %v253_v60 = vsel %vm245_vm3, %v237_v42, 0.0 }
  0x9d   :  { %v269_v21 = vadd.f32 %v268_v59, %v267_v17  ;;  %v254_v23 = vadd.f32 %v253_v60, %v252_v18  ;;  %v114_v10 = vsub.f32 %v508_v12, %v81_v26  ;;  %v220_v40 = vadd.f32 %v219_v32, %v218_v27 }
  0x9e   :  { %v240_v51 = vmul.f32 %v176_v43, %v176_v43  ;;  %v239_v52 = vmul.f32 %v175_v44, %v175_v44  ;;  %v192_v42 = vmul.f32 %v112_v7, %v112_v7  ;;  %v84_v37 = vsel %vm60_vm0, %v82_v54, %v83_v46 }
  0x9f   :  { %v144_v57 = vpop.permute.xlu1 %143  ;;  %v142_v58 = vpop.permute.xlu0 %141  ;;  %v193_v8 = vmul.f32 %v113_v35, %v113_v35  ;;  %v115_v43 = vsub.f32 %v516_v15, %v82_v54  ;;  %v222_v44 = vadd.f32 %v221_v1, %v220_v40  ;;  %v194_v47 = vmul.f32 %v114_v10, %v114_v10 }
  0xa0   :  { %v178_v61 = vsub.f32 %v508_v12, %v144_v57  ;;  %v177_v62 = vsub.f32 %v510_v13, %v142_v58  ;;  %v270_v19 = vsel %vm245_vm3, %v240_v51, 0.0  ;;  %v255_v4 = vsel %vm245_vm3, %v239_v52, 0.0 }
  0xa1   :  { %v271_v30 = vadd.f32 %v270_v19, %v269_v21  ;;  %v256_v31 = vadd.f32 %v255_v4, %v254_v23  ;;  %v206_v13 = vadd.f32 %v205_v33, %v204_v6  ;;  %v116_v12 = vsub.f32 %v514_v14, %v84_v37 }
  0xa2   :  { %v242_v5 = vmul.f32 %v178_v61, %v178_v61  ;;  %v241_v20 = vmul.f32 %v177_v62, %v177_v62  ;;  %v223_v48 = vsel %vm213_vm2, %v192_v42, 0.0  ;;  %v209_v51 = vsel %vm197_vm1, %v193_v8, 0.0 }
  0xa3   :  { %v148_v24 = vpop.permute.xlu1 %147  ;;  %v146_v25 = vpop.permute.xlu0 %145  ;;  %v208_v49 = vadd.f32 %v207_v45, %v206_v13  ;;  %v224_v50 = vadd.f32 %v223_v48, %v222_v44  ;;  %v195_v46 = vmul.f32 %v115_v43, %v115_v43  ;;  %v196_v52 = vmul.f32 %v116_v12, %v116_v12 }
  0xa4   :  { %v272_v3 = vsel %vm245_vm3, %v242_v5, 0.0  ;;  %v257_v11 = vsel %vm245_vm3, %v241_v20, 0.0  ;;  %v180_v28 = vsub.f32 %v514_v14, %v148_v24  ;;  %v179_v29 = vsub.f32 %v516_v15, %v146_v25 }
  0xa5   :  { %v273_v36 = vadd.f32 %v272_v3, %v271_v30  ;;  %v258_v9 = vadd.f32 %v257_v11, %v256_v31  ;;  %v225_v53 = vsel %vm213_vm2, %v194_v47, 0.0  ;;  %v210_v55 = vadd.f32 %v209_v51, %v208_v49 }
  0xa6   :  { %v244_v16 = vmul.f32 %v180_v28, %v180_v28  ;;  %v243_v0 = vmul.f32 %v179_v29, %v179_v29  ;;  %v226_v56 = vadd.f32 %v225_v53, %v224_v50  ;;  %v211_v15 = vsel %vm197_vm1, %v195_v46, 0.0 }
  0xa7   :  { %v227_v54 = vsel %vm213_vm2, %v196_v52, 0.0  ;;  %v212_v57 = vadd.f32 %v211_v15, %v210_v55 }
  0xa8   :  { %v274_v38 = vsel %vm245_vm3, %v244_v16, 0.0  ;;  %v259_v39 = vsel %vm245_vm3, %v243_v0, 0.0  ;;  %v228_v58 = vadd.f32 %v227_v54, %v226_v56 }
  0xa9   :  { %v275_v41 = vadd.f32 %v274_v38, %v273_v36  ;;  %v260_v22 = vadd.f32 %v259_v39, %v258_v9  ;;  %v283_v14 = vrot.slane %v212_v57, 1 }
  0xaa   :  { %v284_v59 = vrot.slane %v228_v58, 1 }
  0xab   :  { %307 = vrot.lane.b32.xlu1 %v275_v41, %s442_s0  ;;  %305 = vrot.lane.b32.xlu0 %v260_v22, %s442_s0 }
  0xac   :  { %v285_v60 = vsel %vm282_vm4, %v283_v14, %v284_v59  ;;  %v290_v62 = vsel %vm289_vm5, %v284_v59, 0.0 }
  0xad   :  { %v288_v61 = vsel %vm213_vm2, %v285_v60, 0.0 }
  0xae   :  { %v291_v63 = vadd.f32 %v290_v62, %v288_v61 }
  0xca   :  { %292 = vadd.xlane.f32.xlu0 %v291_v63 }
 0x11d   :  { %v308_v2 = vpop.permute.xlu1 %307  ;;  %v306_v17 = vpop.permute.xlu0 %305 }
 0x11e   :  { %v313_v18 = vsel %vm311_vm6, %v308_v2, 0.0  ;;  %v312_v19 = vsel %vm311_vm6, %v306_v17, 0.0 }
 0x11f   :  { %v314_v4 = vadd.f32 %v313_v18, %v312_v19 }
 0x121   :  { %315 = vadd.xlane.f32.xlu1 %v314_v4 }
 0x157   :  { %v293_v5 = vpop.xlane.xlu0 %292 }
 0x158   :  { %v294_v20 = vrot.slane %v293_v5, 4 }
 0x15a   :  { %v295_v21 = vadd.f32 %v294_v20, %v293_v5 }
 0x15c   :  { %v296_v23 = vrot.slane %v295_v21, 2 }
 0x15e   :  { %v297_v24 = vadd.f32 %v296_v23, %v295_v21 }
 0x160   :  { %v298_v25 = vrot.slane %v297_v24, 1 }
 0x162   :  { %v299_v26 = vadd.f32 %v298_v25, %v297_v24 }
 0x164   :  { %355 = vpush %v299_v26 }
 0x195   :  { %s356_s26 = spop %355 }
 0x196   :  { %v301_v27 = vstv %s356_s26 }
 0x197   :  { %302 = vst [vmem:[#allocation5] sm:$0x1] %v301_v27 }
 0x198   :  { %399 = shalt.err (!%p396_p12)
}
 0x199   :  { %s400_s3 = scalar_lea.hbm %s646_s1, 16 }
 0x19a   :  { %p401_p13 = scmp.ne.s32.totalorder %s646_s1, %s400_s3  ;;  %p404_p0 = scmp.lt.u32.totalorder %s400_s3, %s646_s1 }
 0x19c   :  { %p406_p1 = pnand %p404_p0, %p401_p13 }
 0x19e   :  { %409 = shalt.err (!%p406_p1)
}
 0x19f   :  { %335 = dma.vmem_to_hbm [thread:$0]  %s333_s25, 16, %s646_s1, [#allocation4]  }
 0x1a0   :  { %s444_s10 = smov [#allocation6]  }
 0x1a1   :  { %s342_s11 = sshll.u32 %s444_s10, 4  ;;  %s343_s11 = int_to_ptr.vmem [resolvable:$true] %s342_s11 }
 0x1a2   :  { %s410_s13 = scalar_lea.vmem %s343_s11, 16  ;;  %s414_s14 = scalar_lea.vmem %s343_s11, 32 }
 0x1a3   :  { %p411_p2 = scmp.ne.s32.totalorder %s343_s11, %s410_s13  ;;  %p415_p3 = scmp.lt.s32.totalorder %s343_s11, %s343_s11 }
 0x1a4   :  { %p416_p4 = scmp.lt.s32.totalorder %s414_s14, %s410_s13 }
 0x1a6   :  { %p417_p5 = por %p416_p4, %p415_p3 }
 0x1a8   :  { %p418_p6 = pnand %p417_p5, %p411_p2 }
 0x1ae   :  { %v316_v3 = vpop.xlane.xlu1 %315 }
 0x1af   :  { %v317_v11 = vrot.slane %v316_v3, 4 }
 0x1b1   :  { %v318_v28 = vadd.f32 %v317_v11, %v316_v3 }
 0x1b3   :  { %v319_v29 = vrot.slane %v318_v28, 2 }
 0x1b5   :  { %v320_v30 = vadd.f32 %v319_v29, %v318_v28 }
 0x1b7   :  { %v321_v31 = vrot.slane %v320_v30, 1 }
 0x1b9   :  { %v322_v7 = vadd.f32 %v321_v31, %v320_v30 }
 0x1bb   :  { %357 = vpush %v322_v7 }
 0x1ec   :  { %s358_s12 = spop %357 }
 0x1ed   :  { %v324_v32 = vstv %s358_s12 }
 0x1ee   :  { %325 = vst [vmem:[#allocation6] sm:$0x1] %v324_v32 }
 0x1ef   :  { %421 = shalt.err (!%p418_p6)
}
 0x1f0   :  { %s422_s16 = scalar_lea.hbm %s647_s2, 16 }
 0x1f1   :  { %p423_p7 = scmp.ne.s32.totalorder %s647_s2, %s422_s16  ;;  %p426_p8 = scmp.lt.u32.totalorder %s422_s16, %s647_s2 }
 0x1f3   :  { %p428_p9 = pnand %p426_p8, %p423_p7 }
 0x1f5   :  { %431 = shalt.err (!%p428_p9)
}
 0x1f6   :  { %345 = dma.vmem_to_hbm [thread:$0]  %s343_s11, 16, %s647_s2, [#allocation7]  }
 0x1f7   :  { %434 = dma.done.wait [#allocation4], 16  }
 0x1f8   :  { %435 = vsyncadd [#allocation4], 4294967280 }
 0x1f9   :  { %436 = dma.done.wait [#allocation7], 16  }
 0x1fa   :  { %437 = vsyncadd [#allocation7], 4294967280 }
 0x1fb   :  { %352 = vsyncpa [#allocation3], 1 }
 0x1fc   :  { %353 = vsyncpa [#allocation4], 1 }
 0x1fd   :  { %354 = vsyncpa [#allocation7], 1 }

</bundles_post_ra>
